<compile_context>
chip_gen: v7x
topology: tpu7x:2x2x1
jax: 0.10.0
libtpu: 0.0.40
codegen_flags: <defaults>
</compile_context>

<pallas_src>
import jax
import jax.numpy as jnp
from jax import lax
from jax.experimental import pallas as pl
from jax.experimental.pallas import tpu as pltpu

_K = 7        # Conv1d kernel size (both blocks)
_STRIDE = 2   # Conv1d stride (both blocks)
_C1 = 8       # block1 out channels
_C2 = 16      # block2 out channels


def _out_len(n, k=_K, s=_STRIDE):
    return (n - k) // s + 1


def _round_up(a, m):
    return (a + m - 1) // m * m


def _build_toeplitz(w, l_in, l_out, stride=_STRIDE):
    """Lower a VALID, stride-2 Conv1d to a dense (Cout*L_out, Cin*L_in) matrix.

    W_big[o*L_out + t, c*L_in + s] = w[o, c, s - stride*t]   if 0 <= s-stride*t < K
                                   = 0                        otherwise
    so  y[o, t, b] = sum_{c,s} W_big[o*L_out+t, c*L_in+s] * x[c, s, b]
    reproduces the conv. ~75% zeros, but the extra MACs run on the otherwise-idle
    MXU — far cheaper than a VPU/XLU tap loop for these tiny channel counts.
    Only valid for modest time windows (matrices stay a few hundred KB).
    """
    c_out, c_in, k = w.shape
    t = jnp.arange(l_out)[:, None]                 # (L_out, 1)
    s = jnp.arange(l_in)[None, :]                  # (1, L_in)
    tap = s - stride * t                           # (L_out, L_in)
    valid = (tap >= 0) & (tap < k)
    tap_c = jnp.clip(tap, 0, k - 1)
    wg = w[:, :, tap_c]                            # (Cout, Cin, L_out, L_in)
    wg = jnp.where(valid[None, None], wg, 0.0)
    return wg.transpose(0, 2, 1, 3).reshape(c_out * l_out, c_in * l_in)


def _expand_bias(b, l_out):
    # row index o*L_out + t  ->  bias b[o]
    return jnp.repeat(b, l_out).reshape(-1, 1)


def fold_bn(w, conv_b, gamma, beta, running_mean, running_var, eps=1e-5):
    """Fold inference BatchNorm1d into the conv weight/bias."""
    scale = gamma / jnp.sqrt(running_var + eps)    # (Cout,)
    w_f = w * scale[:, None, None]
    b_f = (conv_b - running_mean) * scale + beta
    return w_f, b_f


def _tcn_fused_kernel(x_ref, w1_ref, b1_ref, w2_ref, b2_ref, o_ref):
    """Fused block1+block2 (conv+BN+ReLU twice) for one lane-tile of the batch.

    x_ref : (T, Btile)            time on sublanes, batch on lanes
    w1_ref: (8*L1, T)             Toeplitz-lowered, BN-folded block1 weight
    b1_ref: (8*L1, 1)             BN-folded block1 bias (per output row)
    w2_ref: (16*L2, 8*L1)         Toeplitz-lowered, BN-folded block2 weight
    b2_ref: (16*L2, 1)            BN-folded block2 bias (per output row)
    o_ref : (16*L2, Btile)        row index = c*L2 + t  (matches torch .view)
    """
    x = x_ref[...]
    h = jnp.dot(w1_ref[...], x, preferred_element_type=jnp.float32)   # MXU
    h = jnp.maximum(h + b1_ref[...], 0.0)                             # block1 epilogue
    y = jnp.dot(w2_ref[...], h, preferred_element_type=jnp.float32)   # MXU
    y = jnp.maximum(y + b2_ref[...], 0.0)                             # block2 epilogue
    o_ref[...] = y.astype(o_ref.dtype)
    # TODO(synk): training-mode Dropout(0.2) and BatchNorm batch statistics are not
    # implemented (inference semantics: dropout = identity, BN folded into conv).


def tcn_networks_forward(x, params, *, btile_max=512):
    """x: (N, V, T) -> (N, V, 16 * L2). Matches PyTorch tcn_Networks.forward (eval)."""
    N, V, T = x.shape
    B = N * V
    L1 = _out_len(T)
    L2 = _out_len(L1)
    assert T >= _K and L1 >= _K, "time axis too short for two k=7, stride-2 convs"

    rows1, rows2 = _C1 * L1, _C2 * L2
    # Dense conv lowering is sized for the short TCN windows this module uses;
    # fail loudly if someone feeds a huge T instead of silently blowing VMEM.
    assert rows1 * T + rows2 * rows1 <= 4 * 1024 * 1024, "T too large for dense lowering"

    w1big = _build_toeplitz(params["w1"], T, L1)       # (8*L1, T)
    b1big = _expand_bias(params["b1"], L1)             # (8*L1, 1)
    w2big = _build_toeplitz(params["w2"], L1, L2)      # (16*L2, 8*L1)
    b2big = _expand_bias(params["b2"], L2)             # (16*L2, 1)

    # Put the batch (N*V) on the 128-lane axis; pad to a lane-aligned width so
    # every tile is lane-dense (no masked vst) and the grid can pipeline.
    xt = x.reshape(B, T).T                             # (T, B)
    Bp = _round_up(B, 128)
    if Bp != B:
        xt = jnp.pad(xt, ((0, 0), (0, Bp - B)))
    btile = next(t for t in (btile_max, 256, 128) if Bp % t == 0)
    grid = (Bp // btile,)

    out = pl.pallas_call(
        _tcn_fused_kernel,
        out_shape=jax.ShapeDtypeStruct((rows2, Bp), jnp.float32),
        grid=grid,
        in_specs=[
            pl.BlockSpec((T, btile), lambda i: (0, i)),        # x tile (streams)
            pl.BlockSpec((rows1, T), lambda i: (0, 0)),        # weights: constant
            pl.BlockSpec((rows1, 1), lambda i: (0, 0)),        #   block index ->
            pl.BlockSpec((rows2, rows1), lambda i: (0, 0)),    #   stay resident
            pl.BlockSpec((rows2, 1), lambda i: (0, 0)),        #   in VMEM
        ],
        out_specs=pl.BlockSpec((rows2, btile), lambda i: (0, i)),
        compiler_params=pltpu.CompilerParams(
            dimension_semantics=("parallel",),                 # megacore on v7x
        ),
    )(xt, w1big, b1big, w2big, b2big)

    out = out[:, :B]                                   # strip lane padding
    # Kernel row index is c*L2 + t, exactly torch's .view(N, V, -1) flattening of
    # the (N*V, 16, L2) activation; transpose/reshape is cheap wrapper plumbing.
    return out.T.reshape(N, V, _C2 * L2)


# ---- pure-JAX reference (for correctness check) ----------------------------------
def _ref_block(x, w_f, b_f):
    y = lax.conv_general_dilated(
        x, w_f, window_strides=(_STRIDE,), padding="VALID",
        dimension_numbers=("NCH", "OIH", "NCH"))
    y = y + b_f[None, :, None]
    return jnp.maximum(y, 0.0)


def _ref_forward(x, params):
    N, V, T = x.shape
    h = x.reshape(N * V, 1, T)
    h = _ref_block(h, params["w1"], params["b1"])
    h = _ref_block(h, params["w2"], params["b2"])
    return h.reshape(N, V, -1)


if __name__ == "__main__":
    key = jax.random.PRNGKey(0)
    ks = jax.random.split(key, 13)

    # Small deterministic shapes consistent with the module: x is (N, V, T).
    N, V, T = 2, 4, 64
    x = jax.random.normal(ks[0], (N, V, T), dtype=jnp.float32)

    # block1: Conv1d(1, 8, 7, stride=2) + BN(8)
    w1 = 0.3 * jax.random.normal(ks[1], (8, 1, 7), dtype=jnp.float32)
    cb1 = 0.1 * jax.random.normal(ks[2], (8,), dtype=jnp.float32)
    g1 = 1.0 + 0.1 * jax.random.normal(ks[3], (8,), dtype=jnp.float32)
    be1 = 0.1 * jax.random.normal(ks[4], (8,), dtype=jnp.float32)
    m1 = 0.1 * jax.random.normal(ks[5], (8,), dtype=jnp.float32)
    v1 = 0.5 + jnp.abs(jax.random.normal(ks[6], (8,), dtype=jnp.float32))

    # block2: Conv1d(8, 16, 7, stride=2) + BN(16)
    w2 = 0.2 * jax.random.normal(ks[7], (16, 8, 7), dtype=jnp.float32)
    cb2 = 0.1 * jax.random.normal(ks[8], (16,), dtype=jnp.float32)
    g2 = 1.0 + 0.1 * jax.random.normal(ks[9], (16,), dtype=jnp.float32)
    be2 = 0.1 * jax.random.normal(ks[10], (16,), dtype=jnp.float32)
    m2 = 0.1 * jax.random.normal(ks[11], (16,), dtype=jnp.float32)
    v2 = 0.5 + jnp.abs(jax.random.normal(ks[12], (16,), dtype=jnp.float32))

    wf1, bf1 = fold_bn(w1, cb1, g1, be1, m1, v1)
    wf2, bf2 = fold_bn(w2, cb2, g2, be2, m2, v2)
    params = {"w1": wf1, "b1": bf1, "w2": wf2, "b2": bf2}
    # Note: self.fc (nn.Linear(hidden_dim, out_dim)) is never used in forward().

    out = jax.block_until_ready(jax.jit(tcn_networks_forward)(x, params))

    # Shape check: L1 = (64-7)//2+1 = 29, L2 = (29-7)//2+1 = 12, out = (N, V, 16*12)
    assert out.shape == (N, V, 16 * 12), out.shape

    ref = _ref_forward(x, params)
    err = float(jnp.max(jnp.abs(out - ref)))
    # Tolerance allows for reduced-precision MXU accumulation passes; layout or
    # index bugs would show up as O(1) errors.
    assert jnp.allclose(out, ref, atol=3e-2, rtol=3e-2), err

    print("KERNEL_OK")
</pallas_src>

<mosaic_0001>
module attributes {stable_mosaic.version = 11 : i64} {
  func.func @_tcn_fused_kernel(%arg0: i32, %arg1: memref<64x128xf32, #tpu.memory_space<vmem>>, %arg2: memref<232x64xf32, #tpu.memory_space<vmem>>, %arg3: memref<232x1xf32, #tpu.memory_space<vmem>>, %arg4: memref<192x232xf32, #tpu.memory_space<vmem>>, %arg5: memref<192x1xf32, #tpu.memory_space<vmem>>, %arg6: memref<192x128xf32, #tpu.memory_space<vmem>>) attributes {dimension_semantics = [#tpu.dimension_semantics<parallel>], iteration_bounds = array<i64: 1>, scalar_prefetch = 0 : i64, scratch_operands = 0 : i64, tpu.core_type = #tpu.core_type<tc>, window_params = [{transform_indices = @transform_0, window_bounds = array<i64: 64, 128>}, {pipeline_mode = #tpu.pipeline_mode<synchronous>, transform_indices = @transform_1, window_bounds = array<i64: 232, 64>}, {pipeline_mode = #tpu.pipeline_mode<synchronous>, transform_indices = @transform_2, window_bounds = array<i64: 232, 1>}, {pipeline_mode = #tpu.pipeline_mode<synchronous>, transform_indices = @transform_3, window_bounds = array<i64: 192, 232>}, {pipeline_mode = #tpu.pipeline_mode<synchronous>, transform_indices = @transform_4, window_bounds = array<i64: 192, 1>}, {transform_indices = @transform_5, window_bounds = array<i64: 192, 128>}]} {
    %c0 = arith.constant 0 : index
    %c0_0 = arith.constant 0 : index
    %0 = vector.load %arg1[%c0, %c0_0] : memref<64x128xf32, #tpu.memory_space<vmem>>, vector<64x128xf32>
    %c0_1 = arith.constant 0 : index
    %c0_2 = arith.constant 0 : index
    %1 = vector.load %arg2[%c0_1, %c0_2] : memref<232x64xf32, #tpu.memory_space<vmem>>, vector<232x64xf32>
    %cst = arith.constant dense<0.000000e+00> : vector<232x128xf32>
    %2 = tpu.matmul %1, %0, %cst {dimension_numbers = #tpu.dot_dimension_numbers<[1], [0], [0], [1], [0, 0, 1, 1], [], []>} : vector<232x64xf32>, vector<64x128xf32>, vector<232x128xf32> -> vector<232x128xf32>
    %c0_3 = arith.constant 0 : index
    %c0_4 = arith.constant 0 : index
    %3 = vector.load %arg3[%c0_3, %c0_4] : memref<232x1xf32, #tpu.memory_space<vmem>>, vector<232x1xf32>
    %4 = vector.broadcast %3 : vector<232x1xf32> to vector<232x128xf32>
    %5 = arith.addf %2, %4 : vector<232x128xf32>
    %cst_5 = arith.constant 0.000000e+00 : f32
    %6 = vector.broadcast %cst_5 : f32 to vector<232x128xf32>
    %7 = arith.maximumf %5, %6 : vector<232x128xf32>
    %c0_6 = arith.constant 0 : index
    %c0_7 = arith.constant 0 : index
    %8 = vector.load %arg4[%c0_6, %c0_7] : memref<192x232xf32, #tpu.memory_space<vmem>>, vector<192x232xf32>
    %cst_8 = arith.constant dense<0.000000e+00> : vector<192x128xf32>
    %9 = tpu.matmul %8, %7, %cst_8 {dimension_numbers = #tpu.dot_dimension_numbers<[1], [0], [0], [1], [0, 0, 1, 1], [], []>} : vector<192x232xf32>, vector<232x128xf32>, vector<192x128xf32> -> vector<192x128xf32>
    %c0_9 = arith.constant 0 : index
    %c0_10 = arith.constant 0 : index
    %10 = vector.load %arg5[%c0_9, %c0_10] : memref<192x1xf32, #tpu.memory_space<vmem>>, vector<192x1xf32>
    %11 = vector.broadcast %10 : vector<192x1xf32> to vector<192x128xf32>
    %12 = arith.addf %9, %11 : vector<192x128xf32>
    %cst_11 = arith.constant 0.000000e+00 : f32
    %13 = vector.broadcast %cst_11 : f32 to vector<192x128xf32>
    %14 = arith.maximumf %12, %13 : vector<192x128xf32>
    %c0_12 = arith.constant 0 : index
    %c0_13 = arith.constant 0 : index
    %15 = vector.load %arg6[%c0_12, %c0_13] : memref<192x128xf32, #tpu.memory_space<vmem>>, vector<192x128xf32>
    tpu.vector_store %arg6[%c0_12, %c0_13], %14 {strides = array<i32>} : memref<192x128xf32, #tpu.memory_space<vmem>>, vector<192x128xf32>,
    return
  }
  func.func @transform_0(%arg0: i32) -> (i32, i32) {
    %c0_i32 = arith.constant 0 : i32
    %c0_i32_0 = arith.constant 0 : i32
    return %c0_i32, %arg0 : i32, i32
  }
  func.func @transform_1(%arg0: i32) -> (i32, i32) {
    %c0_i32 = arith.constant 0 : i32
    %c0_i32_0 = arith.constant 0 : i32
    %c0_i32_1 = arith.constant 0 : i32
    return %c0_i32, %c0_i32_0 : i32, i32
  }
  func.func @transform_2(%arg0: i32) -> (i32, i32) {
    %c0_i32 = arith.constant 0 : i32
    %c0_i32_0 = arith.constant 0 : i32
    %c0_i32_1 = arith.constant 0 : i32
    return %c0_i32, %c0_i32_0 : i32, i32
  }
  func.func @transform_3(%arg0: i32) -> (i32, i32) {
    %c0_i32 = arith.constant 0 : i32
    %c0_i32_0 = arith.constant 0 : i32
    %c0_i32_1 = arith.constant 0 : i32
    return %c0_i32, %c0_i32_0 : i32, i32
  }
  func.func @transform_4(%arg0: i32) -> (i32, i32) {
    %c0_i32 = arith.constant 0 : i32
    %c0_i32_0 = arith.constant 0 : i32
    %c0_i32_1 = arith.constant 0 : i32
    return %c0_i32, %c0_i32_0 : i32, i32
  }
  func.func @transform_5(%arg0: i32) -> (i32, i32) {
    %c0_i32 = arith.constant 0 : i32
    %c0_i32_0 = arith.constant 0 : i32
    return %c0_i32, %arg0 : i32, i32
  }
}

</mosaic_0001>

<bundles_post_ra>
// kernel: tcn_networks_forward.1
= control target key start
LH: loop header
LB: loop body
LE: loop exit
PB: predicated region body
PF: predicated region fallthrough
CT: control target
= control target key end

     0   :  { %v1343_v0 = vmov 0.0|0.0   ;;  %vm1344_vm0 = vmmov 0   ;;  %v1345_v4 = vmov 0.0   ;;  %v1346_v7 = vmov 0   ;;  %s2008_s0 = inlined_call_operand.vmem [shape: f32[64,128], index: 0, kind: input, shape index: {}]   ;;  %s2009_s2 = inlined_call_operand.vmem [shape: f32[232,1], index: 2, kind: input, shape index: {}]   ;;  %s2010_s1 = inlined_call_operand.vmem [shape: f32[232,64], index: 1, kind: input, shape index: {}]   ;;  %s2011_s4 = inlined_call_operand.vmem [shape: f32[192,1], index: 4, kind: input, shape index: {}]   ;;  %s2012_s3 = inlined_call_operand.vmem [shape: f32[192,232], index: 3, kind: input, shape index: {}]   ;;  %s2013_s5 = inlined_call_operand.vmem [shape: f32[192,128], index: 5, kind: output, shape index: {}]  }
   0x1   :  { %1253 = vmatprep.subr.bf16.mxu0 %v1343_v0  ;;  %v20_v1 = vld [vmem:[%s2008_s0] sm:$0xff]  ;;  %v21_v2 = vld [vmem:[%s2008_s0 + $0x8] sm:$0xff]  ;;  %v22_v3 = vld [vmem:[%s2008_s0 + $0x10] sm:$0xff]  ;;  %1166 = vmatprep.mubr.msk.f32.mxu0 %vm1344_vm0, %v1345_v4  ;;  %vm231_vm1 = vcmask 523264   ;;  %vm750_vm2 = vcmask 850944  }
   0x2   :  { %v1254_v5 = vpack.c.bf16 %v21_v2, %v20_v1  ;;  %v23_v6 = vld [vmem:[%s2008_s0 + $0x18] sm:$0xff]  ;;  %1341 = vset.pattern.permute.xlu0 %v1346_v7  ;;  %1342 = vset.pattern.permute.xlu1 %v1346_v7  ;;  %v24_v9 = vld [vmem:[%s2008_s0 + $0x20] sm:$0xff]  ;;  %v25_v10 = vld [vmem:[%s2008_s0 + $0x28] sm:$0xff] }
   0x3   :  { %1307 = vmatprep.subr.bf16.mxu1 %v1343_v0  ;;  %v1257_v8 = vpack.c.bf16 %v23_v6, %v22_v3  ;;  %v57_v11 = vld [vmem:[%s2009_s2] sm:$0xff]  ;;  %v59_v12 = vld [vmem:[%s2009_s2 + $0x10] sm:$0xff]  ;;  %v1260_v13 = vpack.c.bf16 %v25_v10, %v24_v9  ;;  %v58_v14 = vld [vmem:[%s2009_s2 + $0x8] sm:$0xff] }
   0x4   :  { %1255 = vmatpush3.bf16.msra.mxu0 %v1254_v5  ;;  %88 = vperm.xlu0 %1341, %v57_v11   ;;  %v26_v15 = vld [vmem:[%s2008_s0 + $0x30] sm:$0xff]  ;;  %v27_v16 = vld [vmem:[%s2008_s0 + $0x38] sm:$0xff]  ;;  %v61_v19 = vld [vmem:[%s2009_s2 + $0x20] sm:$0xff] }
   0x5   :  { %1256 = vmatprep.subr.bf16.mxu0 %v1343_v0  ;;  %98 = vperm.xlu1 %1342, %v59_v12   ;;  %v60_v17 = vld [vmem:[%s2009_s2 + $0x18] sm:$0xff]  ;;  %v1263_v18 = vpack.c.bf16 %v27_v16, %v26_v15  ;;  %v62_v20 = vld [vmem:[%s2009_s2 + $0x28] sm:$0xff]  ;;  %v28_v21 = vld [vmem:[%s2010_s1] sm:$0xff] }
   0x6   :  { %v63_v22 = vld [vmem:[%s2009_s2 + $0x30] sm:$0xff]  ;;  %v64_v23 = vld [vmem:[%s2009_s2 + $0x38] sm:$0xff]  ;;  %v29_v24 = vld [vmem:[%s2010_s1 + $0x8] sm:$0xff] }
   0x7   :  { %v65_v25 = vld [vmem:[%s2009_s2 + $0x40] sm:$0xff]  ;;  %v66_v26 = vld [vmem:[%s2009_s2 + $0x48] sm:$0xff]  ;;  %v30_v27 = vld [vmem:[%s2010_s1 + $0x10] sm:$0xff] }
   0x8   :  { %1258 = vmatpush3.bf16.msra.mxu0 %v1257_v8  ;;  %93 = vperm.xlu0 %1341, %v58_v14   ;;  %v67_v28 = vld [vmem:[%s2009_s2 + $0x50] sm:$0xff]  ;;  %v68_v29 = vld [vmem:[%s2009_s2 + $0x58] sm:$0xff]  ;;  %v69_v31 = vld [vmem:[%s2009_s2 + $0x60] sm:$0xff] }
   0x9   :  { %1259 = vmatprep.subr.bf16.mxu0 %v1343_v0  ;;  %103 = vperm.xlu1 %1342, %v60_v17   ;;  %v31_v30 = vld [vmem:[%s2010_s1 + $0x18] sm:$0xff]  ;;  %v70_v32 = vld [vmem:[%s2009_s2 + $0x68] sm:$0xff]  ;;  %v32_v33 = vld [vmem:[%s2010_s1 + $0x20] sm:$0xff] }
   0xa   :  { %v71_v34 = vld [vmem:[%s2009_s2 + $0x70] sm:$0xff]  ;;  %v72_v35 = vld [vmem:[%s2009_s2 + $0x78] sm:$0xff]  ;;  %v33_v36 = vld [vmem:[%s2010_s1 + $0x28] sm:$0xff] }
   0xb   :  { %v73_v37 = vld [vmem:[%s2009_s2 + $0x80] sm:$0xff]  ;;  %v74_v38 = vld [vmem:[%s2009_s2 + $0x88] sm:$0xff]  ;;  %v34_v39 = vld [vmem:[%s2010_s1 + $0x30] sm:$0xff] }
   0xc   :  { %1261 = vmatpush3.bf16.msra.mxu0 %v1260_v13  ;;  %108 = vperm.xlu0 %1341, %v61_v19   ;;  %v75_v40 = vld [vmem:[%s2009_s2 + $0x90] sm:$0xff]  ;;  %v76_v41 = vld [vmem:[%s2009_s2 + $0x98] sm:$0xff]  ;;  %v77_v43 = vld [vmem:[%s2009_s2 + $0xa0] sm:$0xff] }
   0xd   :  { %1262 = vmatprep.subr.bf16.mxu0 %v1343_v0  ;;  %113 = vperm.xlu1 %1342, %v62_v20   ;;  %v35_v42 = vld [vmem:[%s2010_s1 + $0x38] sm:$0xff]  ;;  %v78_v44 = vld [vmem:[%s2009_s2 + $0xa8] sm:$0xff]  ;;  %v36_v45 = vld [vmem:[%s2010_s1 + $0x40] sm:$0xff] }
   0xe   :  { %v79_v46 = vld [vmem:[%s2009_s2 + $0xb0] sm:$0xff]  ;;  %v80_v47 = vld [vmem:[%s2009_s2 + $0xb8] sm:$0xff]  ;;  %v37_v48 = vld [vmem:[%s2010_s1 + $0x48] sm:$0xff] }
   0xf   :  { %v81_v49 = vld [vmem:[%s2009_s2 + $0xc0] sm:$0xff]  ;;  %v82_v50 = vld [vmem:[%s2009_s2 + $0xc8] sm:$0xff]  ;;  %v38_v51 = vld [vmem:[%s2010_s1 + $0x50] sm:$0xff] }
  0x10   :  { %1264 = vmatpush3.bf16.msra.mxu0 %v1263_v18  ;;  %118 = vperm.xlu0 %1341, %v63_v22   ;;  %v83_v52 = vld [vmem:[%s2009_s2 + $0xd0] sm:$0xff]  ;;  %v84_v53 = vld [vmem:[%s2009_s2 + $0xd8] sm:$0xff]  ;;  %v85_v55 = vld [vmem:[%s2009_s2 + $0xe0] sm:$0xff] }
  0x11   :  { %1265 = vmatprep.subr.bf16.mxu0 %v1343_v0  ;;  %123 = vperm.xlu1 %1342, %v64_v23   ;;  %v39_v54 = vld [vmem:[%s2010_s1 + $0x58] sm:$0xff]  ;;  %v606_v56 = vld [vmem:[%s2011_s4] sm:$0xff]  ;;  %v607_v58 = vld [vmem:[%s2011_s4 + $0x8] sm:$0xff] }
  0x12   :  { %v40_v57 = vld [vmem:[%s2010_s1 + $0x60] sm:$0xff]  ;;  %v608_v59 = vld [vmem:[%s2011_s4 + $0x10] sm:$0xff]  ;;  %v41_v60 = vld [vmem:[%s2010_s1 + $0x68] sm:$0xff] }
  0x13   :  { %1167 = vmatmul.mubr.msk.f32.vlgmr.msra.gmra.mrb[0].mxu0 %vm231_vm1, %v28_v21  ;;  %v609_v61 = vld [vmem:[%s2011_s4 + $0x18] sm:$0xff]  ;;  %v610_v62 = vld [vmem:[%s2011_s4 + $0x20] sm:$0xff]  ;;  %v42_v63 = vld [vmem:[%s2010_s1 + $0x70] sm:$0xff] }
  0x14   :  { %1169 = vmatprep.mubr.msk.f32.mxu0 %vm1344_vm0, %v1345_v4  ;;  %128 = vperm.xlu0 %1341, %v65_v25   ;;  %v611_v1 = vld [vmem:[%s2011_s4 + $0x28] sm:$0xff]  ;;  %v612_v2 = vld [vmem:[%s2011_s4 + $0x30] sm:$0xff]  ;;  %v43_v3 = vld [vmem:[%s2010_s1 + $0x78] sm:$0xff] }
  0x15   :  { %133 = vperm.xlu1 %1342, %v66_v26   ;;  %v613_v5 = vld [vmem:[%s2011_s4 + $0x38] sm:$0xff]  ;;  %v614_v6 = vld [vmem:[%s2011_s4 + $0x40] sm:$0xff]  ;;  %v615_v8 = vld [vmem:[%s2011_s4 + $0x48] sm:$0xff] }
  0x16   :  { %v44_v7 = vld [vmem:[%s2010_s1 + $0x80] sm:$0xff]  ;;  %v616_v9 = vld [vmem:[%s2011_s4 + $0x50] sm:$0xff]  ;;  %v45_v10 = vld [vmem:[%s2010_s1 + $0x88] sm:$0xff] }
  0x17   :  { %1170 = vmatmul.mubr.msk.f32.gmra.mrb[2].mxu0 %vm231_vm1, %v29_v24  ;;  %v617_v11 = vld [vmem:[%s2011_s4 + $0x58] sm:$0xff]  ;;  %v618_v12 = vld [vmem:[%s2011_s4 + $0x60] sm:$0xff]  ;;  %v46_v13 = vld [vmem:[%s2010_s1 + $0x90] sm:$0xff] }
  0x18   :  { %1172 = vmatprep.mubr.msk.f32.mxu0 %vm1344_vm0, %v1345_v4  ;;  %138 = vperm.xlu0 %1341, %v67_v28   ;;  %v619_v14 = vld [vmem:[%s2011_s4 + $0x68] sm:$0xff]  ;;  %v620_v15 = vld [vmem:[%s2011_s4 + $0x70] sm:$0xff]  ;;  %v47_v16 = vld [vmem:[%s2010_s1 + $0x98] sm:$0xff] }
  0x19   :  { %143 = vperm.xlu1 %1342, %v68_v29   ;;  %v621_v17 = vld [vmem:[%s2011_s4 + $0x78] sm:$0xff]  ;;  %v622_v18 = vld [vmem:[%s2011_s4 + $0x80] sm:$0xff]  ;;  %v623_v20 = vld [vmem:[%s2011_s4 + $0x88] sm:$0xff] }
  0x1a   :  { %v48_v19 = vld [vmem:[%s2010_s1 + $0xa0] sm:$0xff]  ;;  %v624_v21 = vld [vmem:[%s2011_s4 + $0x90] sm:$0xff]  ;;  %v49_v22 = vld [vmem:[%s2010_s1 + $0xa8] sm:$0xff] }
  0x1b   :  { %1173 = vmatmul.mubr.msk.f32.gmra.mrb[4].mxu0 %vm231_vm1, %v30_v27  ;;  %v625_v23 = vld [vmem:[%s2011_s4 + $0x98] sm:$0xff]  ;;  %v626_v24 = vld [vmem:[%s2011_s4 + $0xa0] sm:$0xff]  ;;  %v50_v25 = vld [vmem:[%s2010_s1 + $0xb0] sm:$0xff] }
  0x1c   :  { %1175 = vmatprep.mubr.msk.f32.mxu0 %vm1344_vm0, %v1345_v4  ;;  %148 = vperm.xlu0 %1341, %v69_v31   ;;  %v627_v26 = vld [vmem:[%s2011_s4 + $0xa8] sm:$0xff]  ;;  %v628_v27 = vld [vmem:[%s2011_s4 + $0xb0] sm:$0xff]  ;;  %v51_v28 = vld [vmem:[%s2010_s1 + $0xb8] sm:$0xff] }
  0x1d   :  { %153 = vperm.xlu1 %1342, %v70_v32   ;;  %v629_v29 = vld [vmem:[%s2011_s4 + $0xb8] sm:$0xff]  ;;  %v53_v31 = vld [vmem:[%s2010_s1 + $0xc8] sm:$0xff]  ;;  %v54_v32 = vld [vmem:[%s2010_s1 + $0xd0] sm:$0xff] }
  0x1f   :  { %1176 = vmatmul.mubr.msk.f32.gmra.mrb[6].mxu0 %vm231_vm1, %v31_v30  ;;  %v52_v30 = vld [vmem:[%s2010_s1 + $0xc0] sm:$0xff] }
  0x20   :  { %1178 = vmatprep.mubr.msk.f32.mxu0 %vm1344_vm0, %v1345_v4  ;;  %158 = vperm.xlu0 %1341, %v71_v34   ;;  %v56_v34 = vld [vmem:[%s2010_s1 + $0xe0] sm:$0xff] }
  0x21   :  { %163 = vperm.xlu1 %1342, %v72_v35   ;;  %v559_v35 = vld [vmem:[%s2012_s3 + $0x8] sm:$0xff] }
  0x23   :  { %1179 = vmatmul.mubr.msk.f32.gmra.mrb[8].mxu0 %vm231_vm1, %v32_v33  ;;  %v55_v33 = vld [vmem:[%s2010_s1 + $0xd8] sm:$0xff] }
  0x24   :  { %1181 = vmatprep.mubr.msk.f32.mxu0 %vm1344_vm0, %v1345_v4  ;;  %168 = vperm.xlu0 %1341, %v73_v37  }
  0x25   :  { %173 = vperm.xlu1 %1342, %v74_v38  }
  0x27   :  { %1182 = vmatmul.mubr.msk.f32.gmra.mrb[10].mxu0 %vm231_vm1, %v33_v36  ;;  %v563_v36 = vld [vmem:[%s2012_s3 + $0x28] sm:$0xff] }
  0x28   :  { %1184 = vmatprep.mubr.msk.f32.mxu0 %vm1344_vm0, %v1345_v4  ;;  %178 = vperm.xlu0 %1341, %v75_v40  }
  0x29   :  { %183 = vperm.xlu1 %1342, %v76_v41   ;;  %1091 = vmatprep.mubr.msk.f32.mxu1 %vm750_vm2, %v563_v36 }
  0x2b   :  { %1185 = vmatmul.mubr.msk.f32.gmra.mrb[12].mxu0 %vm231_vm1, %v34_v39 }
  0x2c   :  { %1187 = vmatprep.mubr.msk.f32.mxu0 %vm1344_vm0, %v1345_v4  ;;  %188 = vperm.xlu0 %1341, %v77_v43  }
  0x2d   :  { %193 = vperm.xlu1 %1342, %v78_v44  }
  0x2f   :  { %1188 = vmatmul.mubr.msk.f32.gmra.mrb[14].mxu0 %vm231_vm1, %v35_v42 }
  0x30   :  { %1190 = vmatprep.mubr.msk.f32.mxu0 %vm1344_vm0, %v1345_v4  ;;  %198 = vperm.xlu0 %1341, %v79_v46  }
  0x31   :  { %203 = vperm.xlu1 %1342, %v80_v47  }
  0x33   :  { %1191 = vmatmul.mubr.msk.f32.gmra.mrb[16].mxu0 %vm231_vm1, %v36_v45 }
  0x34   :  { %1193 = vmatprep.mubr.msk.f32.mxu0 %vm1344_vm0, %v1345_v4  ;;  %208 = vperm.xlu0 %1341, %v81_v49  }
  0x35   :  { %213 = vperm.xlu1 %1342, %v82_v50  }
  0x37   :  { %1194 = vmatmul.mubr.msk.f32.gmra.mrb[18].mxu0 %vm231_vm1, %v37_v48 }
  0x38   :  { %1196 = vmatprep.mubr.msk.f32.mxu0 %vm1344_vm0, %v1345_v4  ;;  %218 = vperm.xlu0 %1341, %v83_v52  }
  0x39   :  { %223 = vperm.xlu1 %1342, %v84_v53  }
  0x3b   :  { %1197 = vmatmul.mubr.msk.f32.gmra.mrb[20].mxu0 %vm231_vm1, %v38_v51 }
  0x3c   :  { %1199 = vmatprep.mubr.msk.f32.mxu0 %vm1344_vm0, %v1345_v4  ;;  %228 = vperm.xlu0 %1341, %v85_v55  }
  0x3d   :  { %632 = vperm.xlu1 %1342, %v606_v56  }
  0x3f   :  { %1200 = vmatmul.mubr.msk.f32.gmra.mrb[22].mxu0 %vm231_vm1, %v39_v54 }
  0x40   :  { %1202 = vmatprep.mubr.msk.f32.mxu0 %vm1344_vm0, %v1345_v4  ;;  %637 = vperm.xlu0 %1341, %v607_v58  }
  0x41   :  { %642 = vperm.xlu1 %1342, %v608_v59  }
  0x43   :  { %1203 = vmatmul.mubr.msk.f32.gmra.mrb[24].mxu0 %vm231_vm1, %v40_v57 }
  0x44   :  { %1205 = vmatprep.mubr.msk.f32.mxu0 %vm1344_vm0, %v1345_v4  ;;  %647 = vperm.xlu0 %1341, %v609_v61  }
  0x45   :  { %652 = vperm.xlu1 %1342, %v610_v62  }
  0x47   :  { %1206 = vmatmul.mubr.msk.f32.gmra.mrb[26].mxu0 %vm231_vm1, %v41_v60 }
  0x48   :  { %1208 = vmatprep.mubr.msk.f32.mxu0 %vm1344_vm0, %v1345_v4  ;;  %657 = vperm.xlu0 %1341, %v611_v1  }
  0x49   :  { %662 = vperm.xlu1 %1342, %v612_v2  }
  0x4b   :  { %1209 = vmatmul.mubr.msk.f32.gmra.mrb[28].mxu0 %vm231_vm1, %v42_v63 }
  0x4c   :  { %1211 = vmatprep.mubr.msk.f32.mxu0 %vm1344_vm0, %v1345_v4  ;;  %667 = vperm.xlu0 %1341, %v613_v5  }
  0x4d   :  { %672 = vperm.xlu1 %1342, %v614_v6  }
  0x4f   :  { %1212 = vmatmul.mubr.msk.f32.gmra.mrb[30].mxu0 %vm231_vm1, %v43_v3 }
  0x50   :  { %1214 = vmatprep.mubr.msk.f32.mxu0 %vm1344_vm0, %v1345_v4  ;;  %677 = vperm.xlu0 %1341, %v615_v8  }
  0x51   :  { %682 = vperm.xlu1 %1342, %v616_v9  }
  0x53   :  { %1215 = vmatmul.mubr.msk.f32.gmra.mrb[32].mxu0 %vm231_vm1, %v44_v7 }
  0x54   :  { %1217 = vmatprep.mubr.msk.f32.mxu0 %vm1344_vm0, %v1345_v4  ;;  %687 = vperm.xlu0 %1341, %v617_v11  }
  0x55   :  { %692 = vperm.xlu1 %1342, %v618_v12  }
  0x57   :  { %1218 = vmatmul.mubr.msk.f32.gmra.mrb[34].mxu0 %vm231_vm1, %v45_v10 }
  0x58   :  { %1220 = vmatprep.mubr.msk.f32.mxu0 %vm1344_vm0, %v1345_v4  ;;  %697 = vperm.xlu0 %1341, %v619_v14  }
  0x59   :  { %702 = vperm.xlu1 %1342, %v620_v15  }
  0x5b   :  { %1221 = vmatmul.mubr.msk.f32.gmra.mrb[36].mxu0 %vm231_vm1, %v46_v13 }
  0x5c   :  { %1223 = vmatprep.mubr.msk.f32.mxu0 %vm1344_vm0, %v1345_v4  ;;  %707 = vperm.xlu0 %1341, %v621_v17  }
  0x5d   :  { %712 = vperm.xlu1 %1342, %v622_v18  }
  0x5f   :  { %1224 = vmatmul.mubr.msk.f32.gmra.mrb[38].mxu0 %vm231_vm1, %v47_v16 }
  0x60   :  { %1226 = vmatprep.mubr.msk.f32.mxu0 %vm1344_vm0, %v1345_v4  ;;  %717 = vperm.xlu0 %1341, %v623_v20  }
  0x61   :  { %722 = vperm.xlu1 %1342, %v624_v21  }
  0x63   :  { %1227 = vmatmul.mubr.msk.f32.gmra.mrb[40].mxu0 %vm231_vm1, %v48_v19 }
  0x64   :  { %1229 = vmatprep.mubr.msk.f32.mxu0 %vm1344_vm0, %v1345_v4  ;;  %727 = vperm.xlu0 %1341, %v625_v23  }
  0x65   :  { %732 = vperm.xlu1 %1342, %v626_v24  }
  0x67   :  { %1230 = vmatmul.mubr.msk.f32.gmra.mrb[42].mxu0 %vm231_vm1, %v49_v22 }
  0x68   :  { %1232 = vmatprep.mubr.msk.f32.mxu0 %vm1344_vm0, %v1345_v4  ;;  %737 = vperm.xlu0 %1341, %v627_v26  }
  0x69   :  { %742 = vperm.xlu1 %1342, %v628_v27  }
  0x6b   :  { %1233 = vmatmul.mubr.msk.f32.gmra.mrb[44].mxu0 %vm231_vm1, %v50_v25 }
  0x6c   :  { %1235 = vmatprep.mubr.msk.f32.mxu0 %vm1344_vm0, %v1345_v4  ;;  %747 = vperm.xlu0 %1341, %v629_v29  }
  0x6f   :  { %1236 = vmatmul.mubr.msk.f32.gmra.mrb[46].mxu0 %vm231_vm1, %v51_v28 }
  0x70   :  { %1238 = vmatprep.mubr.msk.f32.mxu0 %vm1344_vm0, %v1345_v4 }
  0x73   :  { %1239 = vmatmul.mubr.msk.f32.gmra.mrb[48].mxu0 %vm231_vm1, %v52_v30 }
  0x74   :  { %1241 = vmatprep.mubr.msk.f32.mxu0 %vm1344_vm0, %v1345_v4 }
  0x77   :  { %1242 = vmatmul.mubr.msk.f32.gmra.mrb[50].mxu0 %vm231_vm1, %v53_v31 }
  0x78   :  { %1244 = vmatprep.mubr.msk.f32.mxu0 %vm1344_vm0, %v1345_v4 }
  0x7b   :  { %1245 = vmatmul.mubr.msk.f32.gmra.mrb[52].mxu0 %vm231_vm1, %v54_v32 }
  0x7c   :  { %1247 = vmatprep.mubr.msk.f32.mxu0 %vm1344_vm0, %v1345_v4 }
  0x7f   :  { %1248 = vmatmul.mubr.msk.f32.gmra.mrb[54].mxu0 %vm231_vm1, %v55_v33 }
  0x80   :  { %1250 = vmatprep.mubr.msk.f32.mxu0 %vm1344_vm0, %v1345_v4 }
  0x83   :  { %1251 = vmatmul.mubr.msk.f32.gmra.mrb[56].mxu0 %vm231_vm1, %v56_v34  ;;  %v89_v37 = vpop.permute.xlu0 %88 }
  0x84   :  { %1089 = vmatprep.mubr.msk.f32.mxu0 %vm750_vm2, %v559_v35  ;;  %v99_v45 = vpop.permute.xlu1 %98 }
  0x87   :  { %v94_v41 = vpop.permute.xlu0 %93 }
  0x88   :  { %v104_v52 = vpop.permute.xlu1 %103 }
  0x8b   :  { %v109_v61 = vpop.permute.xlu0 %108 }
  0x8c   :  { %v114_v63 = vpop.permute.xlu1 %113 }
  0x8f   :  { %v119_v10 = vpop.permute.xlu0 %118 }
  0x90   :  { %v124_v12 = vpop.permute.xlu1 %123 }
  0x93   :  { %v129_v21 = vpop.permute.xlu0 %128 }
  0x94   :  { %v134_v23 = vpop.permute.xlu1 %133 }
  0x97   :  { %v139_v32 = vpop.permute.xlu0 %138 }
  0x98   :  { %v144_v34 = vpop.permute.xlu1 %143 }
  0xe6   :  { %v385_v38 = vpop.f32.mrb[0].mxu0 }
  0xe7   :  { %v1168_v39 = vpop.f32.mrb[1].mxu0  ;;  %v386_v40 = vadd.f32 %v385_v38, %v89_v37 }
  0xe9   :  { %v529_v46 = vmax.f32 %v386_v40, 0.0 }
  0xea   :  { %v390_v42 = vpop.f32.mrb[2].mxu0 }
  0xeb   :  { %v391_v43 = vadd.f32 %v390_v42, %v94_v41  ;;  %v1171_v44 = vpop.f32.mrb[3].mxu0 }
  0xed   :  { %v530_v47 = vmax.f32 %v391_v43, 0.0  ;;  %v149_v43 = vpop.permute.xlu0 %148 }
  0xee   :  { %v395_v48 = vpop.f32.mrb[4].mxu0 }
  0xef   :  { %v1266_v49 = vpack.c.bf16 %v530_v47, %v529_v46  ;;  %v1174_v50 = vpop.f32.mrb[5].mxu0  ;;  %v396_v51 = vadd.f32 %v395_v48, %v99_v45  ;;  %v154_v45 = vpop.permute.xlu1 %153 }
  0xf1   :  { %1267 = vmatpush1.bf16.msra.mxu0 %v1266_v49  ;;  %1322 = vmatpush1.bf16.msra.mxu1 %v1266_v49  ;;  %v531_v56 = vmax.f32 %v396_v51, 0.0 }
  0xf2   :  { %v400_v53 = vpop.f32.mrb[6].mxu0  ;;  %1268 = vmatprep.subr.bf16.mxu0 %v1343_v0  ;;  %1308 = vmatprep.subr.bf16.mxu1 %v1343_v0 }
  0xf3   :  { %v401_v54 = vadd.f32 %v400_v53, %v104_v52  ;;  %v1177_v55 = vpop.f32.mrb[7].mxu0 }
  0xf5   :  { %v532_v57 = vmax.f32 %v401_v54, 0.0  ;;  %v159_v54 = vpop.permute.xlu0 %158 }
  0xf6   :  { %v405_v58 = vpop.f32.mrb[8].mxu0 }
  0xf7   :  { %v1269_v59 = vpack.c.bf16 %v532_v57, %v531_v56  ;;  %v1180_v60 = vpop.f32.mrb[9].mxu0  ;;  %v406_v62 = vadd.f32 %v405_v58, %v109_v61  ;;  %v164_v56 = vpop.permute.xlu1 %163 }
  0xf9   :  { %1270 = vmatpush1.bf16.msra.mxu0 %v1269_v59  ;;  %1323 = vmatpush1.bf16.msra.mxu1 %v1269_v59  ;;  %v533_v5 = vmax.f32 %v406_v62, 0.0 }
  0xfa   :  { %v410_v1 = vpop.f32.mrb[10].mxu0  ;;  %1271 = vmatprep.subr.bf16.mxu0 %v1343_v0  ;;  %1309 = vmatprep.subr.bf16.mxu1 %v1343_v0 }
  0xfb   :  { %v411_v2 = vadd.f32 %v410_v1, %v114_v63  ;;  %v1183_v3 = vpop.f32.mrb[11].mxu0 }
  0xfd   :  { %v534_v6 = vmax.f32 %v411_v2, 0.0  ;;  %v169_v2 = vpop.permute.xlu0 %168 }
  0xfe   :  { %v415_v7 = vpop.f32.mrb[12].mxu0 }
  0xff   :  { %v1272_v8 = vpack.c.bf16 %v534_v6, %v533_v5  ;;  %v1186_v9 = vpop.f32.mrb[13].mxu0  ;;  %v416_v11 = vadd.f32 %v415_v7, %v119_v10  ;;  %v174_v5 = vpop.permute.xlu1 %173 }
 0x101   :  { %1273 = vmatpush1.bf16.msra.mxu0 %v1272_v8  ;;  %1324 = vmatpush1.bf16.msra.mxu1 %v1272_v8  ;;  %v535_v16 = vmax.f32 %v416_v11, 0.0 }
 0x102   :  { %v420_v13 = vpop.f32.mrb[14].mxu0  ;;  %1274 = vmatprep.subr.bf16.mxu0 %v1343_v0  ;;  %1310 = vmatprep.subr.bf16.mxu1 %v1343_v0 }
 0x103   :  { %v421_v14 = vadd.f32 %v420_v13, %v124_v12  ;;  %v1189_v15 = vpop.f32.mrb[15].mxu0 }
 0x105   :  { %v536_v17 = vmax.f32 %v421_v14, 0.0  ;;  %v179_v14 = vpop.permute.xlu0 %178 }
 0x106   :  { %v425_v18 = vpop.f32.mrb[16].mxu0 }
 0x107   :  { %v1275_v19 = vpack.c.bf16 %v536_v17, %v535_v16  ;;  %v1192_v20 = vpop.f32.mrb[17].mxu0  ;;  %v426_v22 = vadd.f32 %v425_v18, %v129_v21  ;;  %v184_v16 = vpop.permute.xlu1 %183 }
 0x109   :  { %1276 = vmatpush1.bf16.msra.mxu0 %v1275_v19  ;;  %1325 = vmatpush1.bf16.msra.mxu1 %v1275_v19  ;;  %v537_v27 = vmax.f32 %v426_v22, 0.0 }
 0x10a   :  { %v430_v24 = vpop.f32.mrb[18].mxu0  ;;  %1277 = vmatprep.subr.bf16.mxu0 %v1343_v0  ;;  %1311 = vmatprep.subr.bf16.mxu1 %v1343_v0 }
 0x10b   :  { %v431_v25 = vadd.f32 %v430_v24, %v134_v23  ;;  %v1195_v26 = vpop.f32.mrb[19].mxu0 }
 0x10d   :  { %v538_v28 = vmax.f32 %v431_v25, 0.0  ;;  %v189_v25 = vpop.permute.xlu0 %188 }
 0x10e   :  { %v435_v29 = vpop.f32.mrb[20].mxu0 }
 0x10f   :  { %v1278_v30 = vpack.c.bf16 %v538_v28, %v537_v27  ;;  %v1198_v31 = vpop.f32.mrb[21].mxu0  ;;  %v436_v33 = vadd.f32 %v435_v29, %v139_v32  ;;  %v194_v27 = vpop.permute.xlu1 %193 }
 0x111   :  { %1279 = vmatpush1.bf16.msra.mxu0 %v1278_v30  ;;  %1326 = vmatpush1.bf16.msra.mxu1 %v1278_v30  ;;  %v539_v38 = vmax.f32 %v436_v33, 0.0 }
 0x112   :  { %v440_v35 = vpop.f32.mrb[22].mxu0  ;;  %1280 = vmatprep.subr.bf16.mxu0 %v1343_v0  ;;  %1312 = vmatprep.subr.bf16.mxu1 %v1343_v0 }
 0x113   :  { %v441_v36 = vadd.f32 %v440_v35, %v144_v34  ;;  %v1201_v37 = vpop.f32.mrb[23].mxu0 }
 0x115   :  { %v540_v39 = vmax.f32 %v441_v36, 0.0  ;;  %v199_v36 = vpop.permute.xlu0 %198 }
 0x116   :  { %v445_v40 = vpop.f32.mrb[24].mxu0 }
 0x117   :  { %v1281_v41 = vpack.c.bf16 %v540_v39, %v539_v38  ;;  %v1204_v42 = vpop.f32.mrb[25].mxu0  ;;  %v446_v44 = vadd.f32 %v445_v40, %v149_v43  ;;  %v204_v38 = vpop.permute.xlu1 %203 }
 0x119   :  { %1282 = vmatpush1.bf16.msra.mxu0 %v1281_v41  ;;  %1327 = vmatpush1.bf16.msra.mxu1 %v1281_v41  ;;  %v541_v49 = vmax.f32 %v446_v44, 0.0 }
 0x11a   :  { %v450_v46 = vpop.f32.mrb[26].mxu0  ;;  %1283 = vmatprep.subr.bf16.mxu0 %v1343_v0  ;;  %1313 = vmatprep.subr.bf16.mxu1 %v1343_v0 }
 0x11b   :  { %v451_v47 = vadd.f32 %v450_v46, %v154_v45  ;;  %v1207_v48 = vpop.f32.mrb[27].mxu0 }
 0x11d   :  { %v542_v50 = vmax.f32 %v451_v47, 0.0  ;;  %v209_v47 = vpop.permute.xlu0 %208 }
 0x11e   :  { %v455_v51 = vpop.f32.mrb[28].mxu0 }
 0x11f   :  { %v1284_v52 = vpack.c.bf16 %v542_v50, %v541_v49  ;;  %v1210_v53 = vpop.f32.mrb[29].mxu0  ;;  %v456_v55 = vadd.f32 %v455_v51, %v159_v54  ;;  %v214_v49 = vpop.permute.xlu1 %213 }
 0x121   :  { %1285 = vmatpush1.bf16.msra.mxu0 %v1284_v52  ;;  %1328 = vmatpush1.bf16.msra.mxu1 %v1284_v52  ;;  %v543_v60 = vmax.f32 %v456_v55, 0.0 }
 0x122   :  { %v460_v57 = vpop.f32.mrb[30].mxu0  ;;  %1286 = vmatprep.subr.bf16.mxu0 %v1343_v0  ;;  %1314 = vmatprep.subr.bf16.mxu1 %v1343_v0 }
 0x123   :  { %v461_v58 = vadd.f32 %v460_v57, %v164_v56  ;;  %v1213_v59 = vpop.f32.mrb[31].mxu0 }
 0x125   :  { %v544_v61 = vmax.f32 %v461_v58, 0.0  ;;  %v219_v58 = vpop.permute.xlu0 %218 }
 0x126   :  { %v465_v62 = vpop.f32.mrb[32].mxu0 }
 0x127   :  { %v1287_v63 = vpack.c.bf16 %v544_v61, %v543_v60  ;;  %v1216_v1 = vpop.f32.mrb[33].mxu0  ;;  %v466_v3 = vadd.f32 %v465_v62, %v169_v2  ;;  %v224_v60 = vpop.permute.xlu1 %223 }
 0x129   :  { %1288 = vmatpush1.bf16.msra.mxu0 %v1287_v63  ;;  %1329 = vmatpush1.bf16.msra.mxu1 %v1287_v63  ;;  %v545_v9 = vmax.f32 %v466_v3, 0.0  ;;  %v229_v3 = vpop.permute.xlu0 %228 }
 0x12a   :  { %v470_v6 = vpop.f32.mrb[34].mxu0  ;;  %1289 = vmatprep.subr.bf16.mxu0 %v1343_v0  ;;  %1315 = vmatprep.subr.bf16.mxu1 %v1343_v0 }
 0x12b   :  { %v471_v7 = vadd.f32 %v470_v6, %v174_v5  ;;  %v1219_v8 = vpop.f32.mrb[35].mxu0 }
 0x12d   :  { %v546_v10 = vmax.f32 %v471_v7, 0.0 }
 0x12e   :  { %v475_v11 = vpop.f32.mrb[36].mxu0 }
 0x12f   :  { %v1290_v12 = vpack.c.bf16 %v546_v10, %v545_v9  ;;  %v1222_v13 = vpop.f32.mrb[37].mxu0  ;;  %v476_v15 = vadd.f32 %v475_v11, %v179_v14  ;;  %v562_v10 = vld [vmem:[%s2012_s3 + $0x20] sm:$0xff]  ;;  %v561_v11 = vld [vmem:[%s2012_s3 + $0x18] sm:$0xff]  ;;  %v567_v14 = vld [vmem:[%s2012_s3 + $0x48] sm:$0xff] }
 0x130   :  { %v564_v13 = vld [vmem:[%s2012_s3 + $0x30] sm:$0xff] }
 0x131   :  { %1291 = vmatpush1.bf16.msra.mxu0 %v1290_v12  ;;  %1330 = vmatpush1.bf16.msra.mxu1 %v1290_v12  ;;  %v547_v20 = vmax.f32 %v476_v15, 0.0  ;;  %v565_v12 = vld [vmem:[%s2012_s3 + $0x38] sm:$0xff]  ;;  %v566_v15 = vld [vmem:[%s2012_s3 + $0x40] sm:$0xff] }
 0x132   :  { %v480_v17 = vpop.f32.mrb[38].mxu0  ;;  %1292 = vmatprep.subr.bf16.mxu0 %v1343_v0  ;;  %1316 = vmatprep.subr.bf16.mxu1 %v1343_v0 }
 0x133   :  { %v481_v18 = vadd.f32 %v480_v17, %v184_v16  ;;  %v1225_v19 = vpop.f32.mrb[39].mxu0  ;;  %v569_v16 = vld [vmem:[%s2012_s3 + $0x58] sm:$0xff]  ;;  %v568_v17 = vld [vmem:[%s2012_s3 + $0x50] sm:$0xff] }
 0x134   :  { %v570_v19 = vld [vmem:[%s2012_s3 + $0x60] sm:$0xff] }
 0x135   :  { %v548_v21 = vmax.f32 %v481_v18, 0.0  ;;  %v571_v18 = vld [vmem:[%s2012_s3 + $0x68] sm:$0xff] }
 0x136   :  { %v485_v22 = vpop.f32.mrb[40].mxu0 }
 0x137   :  { %v1293_v23 = vpack.c.bf16 %v548_v21, %v547_v20  ;;  %v1228_v24 = vpop.f32.mrb[41].mxu0  ;;  %v486_v26 = vadd.f32 %v485_v22, %v189_v25  ;;  %v573_v20 = vld [vmem:[%s2012_s3 + $0x78] sm:$0xff]  ;;  %v572_v21 = vld [vmem:[%s2012_s3 + $0x70] sm:$0xff]  ;;  %v575_v22 = vld [vmem:[%s2012_s3 + $0x88] sm:$0xff] }
 0x138   :  { %v577_v24 = vld [vmem:[%s2012_s3 + $0x98] sm:$0xff]  ;;  %v576_v25 = vld [vmem:[%s2012_s3 + $0x90] sm:$0xff] }
 0x139   :  { %1294 = vmatpush1.bf16.msra.mxu0 %v1293_v23  ;;  %1331 = vmatpush1.bf16.msra.mxu1 %v1293_v23  ;;  %v549_v31 = vmax.f32 %v486_v26, 0.0  ;;  %v574_v23 = vld [vmem:[%s2012_s3 + $0x80] sm:$0xff]  ;;  %v579_v26 = vld [vmem:[%s2012_s3 + $0xa8] sm:$0xff] }
 0x13a   :  { %v490_v28 = vpop.f32.mrb[42].mxu0  ;;  %1295 = vmatprep.subr.bf16.mxu0 %v1343_v0  ;;  %1317 = vmatprep.subr.bf16.mxu1 %v1343_v0 }
 0x13b   :  { %v491_v29 = vadd.f32 %v490_v28, %v194_v27  ;;  %v1231_v30 = vpop.f32.mrb[43].mxu0  ;;  %v578_v27 = vld [vmem:[%s2012_s3 + $0xa0] sm:$0xff]  ;;  %v581_v28 = vld [vmem:[%s2012_s3 + $0xb8] sm:$0xff] }
 0x13c   :  { %v583_v30 = vld [vmem:[%s2012_s3 + $0xc8] sm:$0xff] }
 0x13d   :  { %v550_v32 = vmax.f32 %v491_v29, 0.0  ;;  %v580_v29 = vld [vmem:[%s2012_s3 + $0xb0] sm:$0xff] }
 0x13e   :  { %v495_v33 = vpop.f32.mrb[44].mxu0 }
 0x13f   :  { %v1296_v34 = vpack.c.bf16 %v550_v32, %v549_v31  ;;  %v1234_v35 = vpop.f32.mrb[45].mxu0  ;;  %v496_v37 = vadd.f32 %v495_v33, %v199_v36  ;;  %v582_v31 = vld [vmem:[%s2012_s3 + $0xc0] sm:$0xff]  ;;  %v585_v32 = vld [vmem:[%s2012_s3 + $0xd8] sm:$0xff]  ;;  %v584_v33 = vld [vmem:[%s2012_s3 + $0xd0] sm:$0xff] }
 0x140   :  { %v586_v35 = vld [vmem:[%s2012_s3 + $0xe0] sm:$0xff]  ;;  %v589_v36 = vld [vmem:[%s2012_s3 + $0xf8] sm:$0xff] }
 0x141   :  { %1297 = vmatpush1.bf16.msra.mxu0 %v1296_v34  ;;  %1332 = vmatpush1.bf16.msra.mxu1 %v1296_v34  ;;  %v551_v42 = vmax.f32 %v496_v37, 0.0  ;;  %v587_v34 = vld [vmem:[%s2012_s3 + $0xe8] sm:$0xff]  ;;  %v588_v37 = vld [vmem:[%s2012_s3 + $0xf0] sm:$0xff] }
 0x142   :  { %v500_v39 = vpop.f32.mrb[46].mxu0  ;;  %1298 = vmatprep.subr.bf16.mxu0 %v1343_v0  ;;  %1318 = vmatprep.subr.bf16.mxu1 %v1343_v0 }
 0x143   :  { %v501_v40 = vadd.f32 %v500_v39, %v204_v38  ;;  %v1237_v41 = vpop.f32.mrb[47].mxu0  ;;  %v591_v38 = vld [vmem:[%s2012_s3 + $0x108] sm:$0xff]  ;;  %v590_v39 = vld [vmem:[%s2012_s3 + $0x100] sm:$0xff] }
 0x144   :  { %v592_v41 = vld [vmem:[%s2012_s3 + $0x110] sm:$0xff] }
 0x145   :  { %v552_v43 = vmax.f32 %v501_v40, 0.0  ;;  %v593_v40 = vld [vmem:[%s2012_s3 + $0x118] sm:$0xff] }
 0x146   :  { %v505_v44 = vpop.f32.mrb[48].mxu0 }
 0x147   :  { %v1299_v45 = vpack.c.bf16 %v552_v43, %v551_v42  ;;  %v1240_v46 = vpop.f32.mrb[49].mxu0  ;;  %v506_v48 = vadd.f32 %v505_v44, %v209_v47  ;;  %v595_v42 = vld [vmem:[%s2012_s3 + $0x128] sm:$0xff]  ;;  %v594_v43 = vld [vmem:[%s2012_s3 + $0x120] sm:$0xff]  ;;  %v597_v44 = vld [vmem:[%s2012_s3 + $0x138] sm:$0xff] }
 0x148   :  { %v599_v46 = vld [vmem:[%s2012_s3 + $0x148] sm:$0xff]  ;;  %v598_v47 = vld [vmem:[%s2012_s3 + $0x140] sm:$0xff] }
 0x149   :  { %1300 = vmatpush1.bf16.msra.mxu0 %v1299_v45  ;;  %1333 = vmatpush1.bf16.msra.mxu1 %v1299_v45  ;;  %v553_v53 = vmax.f32 %v506_v48, 0.0  ;;  %v596_v45 = vld [vmem:[%s2012_s3 + $0x130] sm:$0xff]  ;;  %v601_v48 = vld [vmem:[%s2012_s3 + $0x158] sm:$0xff] }
 0x14a   :  { %v510_v50 = vpop.f32.mrb[50].mxu0  ;;  %1301 = vmatprep.subr.bf16.mxu0 %v1343_v0  ;;  %1319 = vmatprep.subr.bf16.mxu1 %v1343_v0 }
 0x14b   :  { %v511_v51 = vadd.f32 %v510_v50, %v214_v49  ;;  %v1243_v52 = vpop.f32.mrb[51].mxu0  ;;  %v600_v49 = vld [vmem:[%s2012_s3 + $0x150] sm:$0xff]  ;;  %v603_v50 = vld [vmem:[%s2012_s3 + $0x168] sm:$0xff] }
 0x14c   :  { %v605_v52 = vld [vmem:[%s2012_s3 + $0x178] sm:$0xff] }
 0x14d   :  { %v554_v54 = vmax.f32 %v511_v51, 0.0  ;;  %v602_v51 = vld [vmem:[%s2012_s3 + $0x160] sm:$0xff] }
 0x14e   :  { %v515_v55 = vpop.f32.mrb[52].mxu0 }
 0x14f   :  { %v1302_v56 = vpack.c.bf16 %v554_v54, %v553_v53  ;;  %v1246_v57 = vpop.f32.mrb[53].mxu0  ;;  %v516_v59 = vadd.f32 %v515_v55, %v219_v58  ;;  %v604_v53 = vld [vmem:[%s2012_s3 + $0x170] sm:$0xff]  ;;  %v633_v54 = vpop.permute.xlu1 %632 }
 0x150   :  { %v638_v55 = vpop.permute.xlu0 %637 }
 0x151   :  { %1303 = vmatpush1.bf16.msra.mxu0 %v1302_v56  ;;  %1334 = vmatpush1.bf16.msra.mxu1 %v1302_v56  ;;  %v555_v1 = vmax.f32 %v516_v59, 0.0 }
 0x152   :  { %v520_v61 = vpop.f32.mrb[54].mxu0  ;;  %1304 = vmatprep.subr.bf16.mxu0 %v1343_v0  ;;  %1320 = vmatprep.subr.bf16.mxu1 %v1343_v0  ;;  %v558_v0 = vld [vmem:[%s2012_s3] sm:$0xff] }
 0x153   :  { %v521_v62 = vadd.f32 %v520_v61, %v224_v60  ;;  %v1249_v63 = vpop.f32.mrb[55].mxu0  ;;  %v643_v56 = vpop.permute.xlu1 %642 }
 0x154   :  { %v648_v63 = vpop.permute.xlu0 %647 }
 0x155   :  { %v556_v2 = vmax.f32 %v521_v62, 0.0 }
 0x156   :  { %v525_v5 = vpop.f32.mrb[56].mxu0 }
 0x157   :  { %v1305_v6 = vpack.c.bf16 %v556_v2, %v555_v1  ;;  %v526_v7 = vadd.f32 %v525_v5, %v229_v3  ;;  %v1252_v8 = vpop.f32.mrb[57].mxu0 }
 0x159   :  { %1306 = vmatpush1.bf16.msra.mxu0 %v1305_v6  ;;  %1335 = vmatpush1.bf16.msra.mxu1 %v1305_v6  ;;  %v557_v9 = vmax.f32 %v526_v7, 0.0 }
 0x15a   :  { %879 = vmatprep.subr.mxu0 %v1345_v4  ;;  %1321 = vmatprep.subr.mxu1 %v1345_v4  ;;  %v560_v4 = vld [vmem:[%s2012_s3 + $0x10] sm:$0xff] }
 0x15d   :  { %880 = vmatpush1.msra.mxu0 %v557_v9  ;;  %1336 = vmatpush1.msra.mxu1 %v557_v9 }
 0x15e   :  { %888 = vmatmul.mubr.f32.vlgmr.msra.gmra.mrb[58].mxu0 %v558_v0  ;;  %898 = vmatmul.mubr.f32.vlgmr.msra.gmra.mrb[0].mxu1 %v562_v10 }
 0x15f   :  { %1090 = vmatprep.mubr.msk.f32.mxu0 %vm750_vm2, %v561_v11  ;;  %1092 = vmatprep.mubr.msk.f32.mxu1 %vm750_vm2, %v565_v12  ;;  %v653_v11 = vpop.permute.xlu1 %652 }
 0x162   :  { %893 = vmatmul.mubr.f32.gmra.mrb[60].mxu0 %v560_v4  ;;  %903 = vmatmul.mubr.f32.gmra.mrb[2].mxu1 %v564_v13 }
 0x163   :  { %1093 = vmatprep.mubr.msk.f32.mxu1 %vm750_vm2, %v567_v14 }
 0x166   :  { %908 = vmatmul.mubr.f32.gmra.mrb[4].mxu1 %v566_v15  ;;  %v658_v15 = vpop.permute.xlu0 %657 }
 0x167   :  { %1094 = vmatprep.mubr.msk.f32.mxu1 %vm750_vm2, %v569_v16 }
 0x16a   :  { %913 = vmatmul.mubr.f32.gmra.mrb[6].mxu1 %v568_v17 }
 0x16b   :  { %1095 = vmatprep.mubr.msk.f32.mxu1 %vm750_vm2, %v571_v18 }
 0x16e   :  { %918 = vmatmul.mubr.f32.gmra.mrb[8].mxu1 %v570_v19 }
 0x16f   :  { %1096 = vmatprep.mubr.msk.f32.mxu1 %vm750_vm2, %v573_v20  ;;  %v663_v20 = vpop.permute.xlu1 %662 }
 0x172   :  { %923 = vmatmul.mubr.f32.gmra.mrb[10].mxu1 %v572_v21 }
 0x173   :  { %1097 = vmatprep.mubr.msk.f32.mxu1 %vm750_vm2, %v575_v22 }
 0x176   :  { %928 = vmatmul.mubr.f32.gmra.mrb[12].mxu1 %v574_v23 }
 0x177   :  { %1098 = vmatprep.mubr.msk.f32.mxu1 %vm750_vm2, %v577_v24 }
 0x17a   :  { %933 = vmatmul.mubr.f32.gmra.mrb[14].mxu1 %v576_v25  ;;  %v668_v25 = vpop.permute.xlu0 %667 }
 0x17b   :  { %1099 = vmatprep.mubr.msk.f32.mxu1 %vm750_vm2, %v579_v26 }
 0x17e   :  { %938 = vmatmul.mubr.f32.gmra.mrb[16].mxu1 %v578_v27 }
 0x17f   :  { %1100 = vmatprep.mubr.msk.f32.mxu1 %vm750_vm2, %v581_v28 }
 0x182   :  { %943 = vmatmul.mubr.f32.gmra.mrb[18].mxu1 %v580_v29 }
 0x183   :  { %1101 = vmatprep.mubr.msk.f32.mxu1 %vm750_vm2, %v583_v30  ;;  %v673_v30 = vpop.permute.xlu1 %672 }
 0x186   :  { %948 = vmatmul.mubr.f32.gmra.mrb[20].mxu1 %v582_v31 }
 0x187   :  { %1102 = vmatprep.mubr.msk.f32.mxu1 %vm750_vm2, %v585_v32 }
 0x18a   :  { %953 = vmatmul.mubr.f32.gmra.mrb[22].mxu1 %v584_v33 }
 0x18b   :  { %1103 = vmatprep.mubr.msk.f32.mxu1 %vm750_vm2, %v587_v34 }
 0x18e   :  { %958 = vmatmul.mubr.f32.gmra.mrb[24].mxu1 %v586_v35  ;;  %v678_v35 = vpop.permute.xlu0 %677 }
 0x18f   :  { %1104 = vmatprep.mubr.msk.f32.mxu1 %vm750_vm2, %v589_v36 }
 0x192   :  { %963 = vmatmul.mubr.f32.gmra.mrb[26].mxu1 %v588_v37 }
 0x193   :  { %1105 = vmatprep.mubr.msk.f32.mxu1 %vm750_vm2, %v591_v38 }
 0x196   :  { %968 = vmatmul.mubr.f32.gmra.mrb[28].mxu1 %v590_v39 }
 0x197   :  { %1106 = vmatprep.mubr.msk.f32.mxu1 %vm750_vm2, %v593_v40  ;;  %v683_v40 = vpop.permute.xlu1 %682 }
 0x19a   :  { %973 = vmatmul.mubr.f32.gmra.mrb[30].mxu1 %v592_v41 }
 0x19b   :  { %1107 = vmatprep.mubr.msk.f32.mxu1 %vm750_vm2, %v595_v42 }
 0x19e   :  { %978 = vmatmul.mubr.f32.gmra.mrb[32].mxu1 %v594_v43 }
 0x19f   :  { %1108 = vmatprep.mubr.msk.f32.mxu1 %vm750_vm2, %v597_v44 }
 0x1a2   :  { %983 = vmatmul.mubr.f32.gmra.mrb[34].mxu1 %v596_v45  ;;  %v688_v45 = vpop.permute.xlu0 %687 }
 0x1a3   :  { %1109 = vmatprep.mubr.msk.f32.mxu1 %vm750_vm2, %v599_v46 }
 0x1a6   :  { %988 = vmatmul.mubr.f32.gmra.mrb[36].mxu1 %v598_v47 }
 0x1a7   :  { %1110 = vmatprep.mubr.msk.f32.mxu1 %vm750_vm2, %v601_v48 }
 0x1aa   :  { %993 = vmatmul.mubr.f32.gmra.mrb[38].mxu1 %v600_v49 }
 0x1ab   :  { %1111 = vmatprep.mubr.msk.f32.mxu1 %vm750_vm2, %v603_v50  ;;  %v693_v50 = vpop.permute.xlu1 %692 }
 0x1ae   :  { %998 = vmatmul.mubr.f32.gmra.mrb[40].mxu1 %v602_v51 }
 0x1af   :  { %1112 = vmatprep.mubr.msk.f32.mxu1 %vm750_vm2, %v605_v52 }
 0x1b2   :  { %1003 = vmatmul.mubr.f32.gmra.mrb[42].mxu1 %v604_v53 }
 0x231   :  { %v889_v57 = vpop.f32.mrb[58].mxu0  ;;  %v899_v58 = vpop.f32.mrb[0].mxu1 }
 0x232   :  { %v890_v59 = vadd.f32 %v889_v57, %v633_v54  ;;  %v900_v60 = vadd.f32 %v899_v58, %v643_v56  ;;  %v901_v61 = vpop.f32.mrb[1].mxu1  ;;  %v891_v62 = vpop.f32.mrb[59].mxu0 }
 0x234   :  { %v1008_v1 = vmax.f32 %v890_v59, 0.0  ;;  %v1010_v2 = vmax.f32 %v900_v60, 0.0  ;;  %v703_v60 = vpop.permute.xlu1 %702 }
 0x235   :  { %v894_v3 = vpop.f32.mrb[60].mxu0  ;;  %v904_v5 = vpop.f32.mrb[2].mxu1 }
 0x236   :  { %1032 = vst [vmem:[%s2013_s5] sm:$0xff] %v1008_v1  ;;  %1034 = vst [vmem:[%s2013_s5 + $0x10] sm:$0xff] %v1010_v2  ;;  %v895_v6 = vadd.f32 %v894_v3, %v638_v55  ;;  %v905_v7 = vadd.f32 %v904_v5, %v648_v63  ;;  %v906_v8 = vpop.f32.mrb[3].mxu1  ;;  %v896_v9 = vpop.f32.mrb[61].mxu0 }
 0x237   :  { %v698_v55 = vpop.permute.xlu0 %697 }
 0x238   :  { %v1009_v0 = vmax.f32 %v895_v6, 0.0  ;;  %v1011_v10 = vmax.f32 %v905_v7, 0.0  ;;  %v713_v8 = vpop.permute.xlu1 %712 }
 0x239   :  { %v909_v12 = vpop.f32.mrb[4].mxu1 }
 0x23a   :  { %1033 = vst [vmem:[%s2013_s5 + $0x8] sm:$0xff] %v1009_v0  ;;  %1035 = vst [vmem:[%s2013_s5 + $0x18] sm:$0xff] %v1011_v10  ;;  %v910_v4 = vadd.f32 %v909_v12, %v653_v11  ;;  %v911_v13 = vpop.f32.mrb[5].mxu1 }
 0x23b   :  { %v708_v2 = vpop.permute.xlu0 %707 }
 0x23c   :  { %v1012_v14 = vmax.f32 %v910_v4, 0.0 }
 0x23d   :  { %v914_v16 = vpop.f32.mrb[6].mxu1 }
 0x23e   :  { %1036 = vst [vmem:[%s2013_s5 + $0x20] sm:$0xff] %v1012_v14  ;;  %v915_v17 = vadd.f32 %v914_v16, %v658_v15  ;;  %v916_v18 = vpop.f32.mrb[7].mxu1  ;;  %v723_v16 = vpop.permute.xlu1 %722 }
 0x23f   :  { %v718_v12 = vpop.permute.xlu0 %717 }
 0x240   :  { %v1013_v19 = vmax.f32 %v915_v17, 0.0 }
 0x241   :  { %v919_v21 = vpop.f32.mrb[8].mxu1 }
 0x242   :  { %1037 = vst [vmem:[%s2013_s5 + $0x28] sm:$0xff] %v1013_v19  ;;  %v920_v22 = vadd.f32 %v919_v21, %v663_v20  ;;  %v921_v23 = vpop.f32.mrb[9].mxu1 }
 0x243   :  { %v728_v21 = vpop.permute.xlu0 %727 }
 0x244   :  { %v1014_v24 = vmax.f32 %v920_v22, 0.0 }
 0x245   :  { %v924_v26 = vpop.f32.mrb[10].mxu1 }
 0x246   :  { %1038 = vst [vmem:[%s2013_s5 + $0x30] sm:$0xff] %v1014_v24  ;;  %v925_v27 = vadd.f32 %v924_v26, %v668_v25  ;;  %v926_v28 = vpop.f32.mrb[11].mxu1  ;;  %v733_v26 = vpop.permute.xlu1 %732 }
 0x248   :  { %v1015_v29 = vmax.f32 %v925_v27, 0.0 }
 0x249   :  { %v929_v31 = vpop.f32.mrb[12].mxu1 }
 0x24a   :  { %1039 = vst [vmem:[%s2013_s5 + $0x38] sm:$0xff] %v1015_v29  ;;  %v930_v32 = vadd.f32 %v929_v31, %v673_v30  ;;  %v931_v33 = vpop.f32.mrb[13].mxu1  ;;  %v738_v31 = vpop.permute.xlu0 %737 }
 0x24c   :  { %v1016_v34 = vmax.f32 %v930_v32, 0.0 }
 0x24d   :  { %v934_v36 = vpop.f32.mrb[14].mxu1 }
 0x24e   :  { %1040 = vst [vmem:[%s2013_s5 + $0x40] sm:$0xff] %v1016_v34  ;;  %v935_v37 = vadd.f32 %v934_v36, %v678_v35  ;;  %v936_v38 = vpop.f32.mrb[15].mxu1  ;;  %v743_v36 = vpop.permute.xlu1 %742 }
 0x250   :  { %v1017_v39 = vmax.f32 %v935_v37, 0.0 }
 0x251   :  { %v939_v41 = vpop.f32.mrb[16].mxu1 }
 0x252   :  { %1041 = vst [vmem:[%s2013_s5 + $0x48] sm:$0xff] %v1017_v39  ;;  %v940_v42 = vadd.f32 %v939_v41, %v683_v40  ;;  %v941_v43 = vpop.f32.mrb[17].mxu1  ;;  %v748_v41 = vpop.permute.xlu0 %747 }
 0x254   :  { %v1018_v44 = vmax.f32 %v940_v42, 0.0 }
 0x255   :  { %v944_v46 = vpop.f32.mrb[18].mxu1 }
 0x256   :  { %1042 = vst [vmem:[%s2013_s5 + $0x50] sm:$0xff] %v1018_v44  ;;  %v945_v47 = vadd.f32 %v944_v46, %v688_v45  ;;  %v946_v48 = vpop.f32.mrb[19].mxu1 }
 0x258   :  { %v1019_v49 = vmax.f32 %v945_v47, 0.0 }
 0x259   :  { %v949_v51 = vpop.f32.mrb[20].mxu1 }
 0x25a   :  { %1043 = vst [vmem:[%s2013_s5 + $0x58] sm:$0xff] %v1019_v49  ;;  %v950_v52 = vadd.f32 %v949_v51, %v693_v50  ;;  %v951_v53 = vpop.f32.mrb[21].mxu1 }
 0x25c   :  { %v1020_v54 = vmax.f32 %v950_v52, 0.0 }
 0x25d   :  { %v954_v56 = vpop.f32.mrb[22].mxu1 }
 0x25e   :  { %1044 = vst [vmem:[%s2013_s5 + $0x60] sm:$0xff] %v1020_v54  ;;  %v955_v57 = vadd.f32 %v954_v56, %v698_v55  ;;  %v956_v58 = vpop.f32.mrb[23].mxu1 }
 0x260   :  { %v1021_v59 = vmax.f32 %v955_v57, 0.0 }
 0x261   :  { %v959_v61 = vpop.f32.mrb[24].mxu1 }
 0x262   :  { %1045 = vst [vmem:[%s2013_s5 + $0x68] sm:$0xff] %v1021_v59  ;;  %v960_v62 = vadd.f32 %v959_v61, %v703_v60  ;;  %v961_v63 = vpop.f32.mrb[25].mxu1 }
 0x264   :  { %v1022_v1 = vmax.f32 %v960_v62, 0.0 }
 0x265   :  { %v964_v3 = vpop.f32.mrb[26].mxu1 }
 0x266   :  { %1046 = vst [vmem:[%s2013_s5 + $0x70] sm:$0xff] %v1022_v1  ;;  %v965_v5 = vadd.f32 %v964_v3, %v708_v2  ;;  %v966_v6 = vpop.f32.mrb[27].mxu1 }
 0x268   :  { %v1023_v7 = vmax.f32 %v965_v5, 0.0 }
 0x269   :  { %v969_v9 = vpop.f32.mrb[28].mxu1 }
 0x26a   :  { %1047 = vst [vmem:[%s2013_s5 + $0x78] sm:$0xff] %v1023_v7  ;;  %v970_v0 = vadd.f32 %v969_v9, %v713_v8  ;;  %v971_v10 = vpop.f32.mrb[29].mxu1 }
 0x26c   :  { %v1024_v11 = vmax.f32 %v970_v0, 0.0 }
 0x26d   :  { %v974_v4 = vpop.f32.mrb[30].mxu1 }
 0x26e   :  { %1048 = vst [vmem:[%s2013_s5 + $0x80] sm:$0xff] %v1024_v11  ;;  %v975_v13 = vadd.f32 %v974_v4, %v718_v12  ;;  %v976_v14 = vpop.f32.mrb[31].mxu1 }
 0x270   :  { %v1025_v15 = vmax.f32 %v975_v13, 0.0 }
 0x271   :  { %v979_v17 = vpop.f32.mrb[32].mxu1 }
 0x272   :  { %1049 = vst [vmem:[%s2013_s5 + $0x88] sm:$0xff] %v1025_v15  ;;  %v980_v18 = vadd.f32 %v979_v17, %v723_v16  ;;  %v981_v19 = vpop.f32.mrb[33].mxu1 }
 0x274   :  { %v1026_v20 = vmax.f32 %v980_v18, 0.0 }
 0x275   :  { %v984_v22 = vpop.f32.mrb[34].mxu1 }
 0x276   :  { %1050 = vst [vmem:[%s2013_s5 + $0x90] sm:$0xff] %v1026_v20  ;;  %v985_v23 = vadd.f32 %v984_v22, %v728_v21  ;;  %v986_v24 = vpop.f32.mrb[35].mxu1 }
 0x278   :  { %v1027_v25 = vmax.f32 %v985_v23, 0.0 }
 0x279   :  { %v989_v27 = vpop.f32.mrb[36].mxu1 }
 0x27a   :  { %1051 = vst [vmem:[%s2013_s5 + $0x98] sm:$0xff] %v1027_v25  ;;  %v990_v28 = vadd.f32 %v989_v27, %v733_v26  ;;  %v991_v29 = vpop.f32.mrb[37].mxu1 }
 0x27c   :  { %v1028_v30 = vmax.f32 %v990_v28, 0.0 }
 0x27d   :  { %v994_v32 = vpop.f32.mrb[38].mxu1 }
 0x27e   :  { %1052 = vst [vmem:[%s2013_s5 + $0xa0] sm:$0xff] %v1028_v30  ;;  %v995_v33 = vadd.f32 %v994_v32, %v738_v31  ;;  %v996_v34 = vpop.f32.mrb[39].mxu1 }
 0x280   :  { %v1029_v35 = vmax.f32 %v995_v33, 0.0 }
 0x281   :  { %v999_v37 = vpop.f32.mrb[40].mxu1 }
 0x282   :  { %1053 = vst [vmem:[%s2013_s5 + $0xa8] sm:$0xff] %v1029_v35  ;;  %v1000_v38 = vadd.f32 %v999_v37, %v743_v36  ;;  %v1001_v39 = vpop.f32.mrb[41].mxu1 }
 0x284   :  { %v1030_v40 = vmax.f32 %v1000_v38, 0.0 }
 0x285   :  { %v1004_v42 = vpop.f32.mrb[42].mxu1 }
 0x286   :  { %1054 = vst [vmem:[%s2013_s5 + $0xb0] sm:$0xff] %v1030_v40  ;;  %v1005_v43 = vadd.f32 %v1004_v42, %v748_v41  ;;  %v1006_v44 = vpop.f32.mrb[43].mxu1 }
 0x288   :  { %v1031_v45 = vmax.f32 %v1005_v43, 0.0 }
 0x28a   :  { %1055 = vst [vmem:[%s2013_s5 + $0xb8] sm:$0xff] %v1031_v45 }

</bundles_post_ra>
